<compile_context>
chip_gen: v7x
topology: tpu7x:2x2x1
jax: 0.10.0
libtpu: 0.0.40
codegen_flags: <defaults>
</compile_context>

<pallas_src>
import functools

import numpy as np
import jax
import jax.numpy as jnp
from jax.experimental import pallas as pl
from jax.experimental.pallas import tpu as pltpu

_LANE = 128
_SUB = 8


def _clip_normal_kernel(seed_ref, x_ref, o_ref, *, block_rows, cols,
                        sqrt_sigma, min_val, max_val):
    shape = (block_rows, cols)

    # Global flat index of each element in this block (row-major over the
    # padded slab).  The random stream depends only on (index, seed), so the
    # output is independent of block_rows / cols.
    i_row = jax.lax.broadcasted_iota(jnp.int32, shape, 0)
    i_col = jax.lax.broadcasted_iota(jnp.int32, shape, 1)
    gidx = (pl.program_id(0) * block_rows + i_row) * cols + i_col

    # ---- counter-based RNG: hash(index, seed) -> uniform in (0, 1) ---------
    h = gidx.astype(jnp.uint32) * jnp.uint32(0x9E3779B9)
    h = h ^ (seed_ref[0].astype(jnp.uint32) + jnp.uint32(0x85EBCA6B))
    # lowbias32 avalanche mixer
    h = h ^ (h >> 16)
    h = h * jnp.uint32(0x7FEB352D)
    h = h ^ (h >> 15)
    h = h * jnp.uint32(0x846CA68B)
    h = h ^ (h >> 16)
    # top 24 bits -> uniform strictly inside (0, 1)
    u = ((h >> 8).astype(jnp.int32).astype(jnp.float32) + 0.5) \
        * jnp.float32(2.0 ** -24)

    # ---- uniform -> standard normal:  z = sqrt(2) * erfinv(2u - 1) ---------
    # Giles (2010) single-precision erfinv approximation (log/sqrt/FMA only).
    t = 2.0 * u - 1.0                      # in (-1, 1)
    w = -jnp.log((1.0 - t) * (1.0 + t))    # >= 0, bounded (~16) by the 0.5 offset
    wc = w - 2.5
    p = jnp.float32(2.81022636e-08)
    for c in (3.43273939e-07, -3.5233877e-06, -4.39150654e-06, 2.1858087e-04,
              -1.25372503e-03, -4.17768164e-03, 2.46640727e-01, 1.50140941e+00):
        p = jnp.float32(c) + p * wc
    wt = jnp.sqrt(w) - 3.0
    q = jnp.float32(-2.00214257e-04)
    for c in (1.00950558e-04, 1.34934322e-03, -3.67342844e-03, 5.73950773e-03,
              -7.62246130e-03, 9.43887047e-03, 1.00167406e+00, 2.83297682e+00):
        q = jnp.float32(c) + q * wt
    eps = jnp.where(w < 5.0, p, q) * t * jnp.float32(np.sqrt(2.0))

    samp = x_ref[...].astype(jnp.float32) + jnp.float32(sqrt_sigma) * eps
    # Statically skip the clamps when they are +/-inf (clamp_min_/clamp_max_).
    if np.isfinite(min_val):
        samp = jnp.maximum(samp, jnp.float32(min_val))
    if np.isfinite(max_val):
        samp = jnp.minimum(samp, jnp.float32(max_val))
    o_ref[...] = samp.astype(o_ref.dtype)


def clip_normal_proposal(x, seed, sigma, min_val=-np.inf, max_val=np.inf,
                         *, block_rows=None, cols=None):
    """JAX/Pallas equivalent of ClipNormalProposal(sigma, min_val, max_val)(x)."""
    orig_shape = x.shape
    n = x.size

    # Lane-dense slab width: multiple of 128, shrunk for tiny inputs so the
    # padding overhead stays small.
    if cols is None:
        cols = 4 * _LANE                       # 512 lanes -> unmasked stores
        while cols > _LANE and n < cols * _SUB:
            cols //= 2
    assert cols % _LANE == 0

    rows = -(-n // cols)
    # Block height: multiple of 8; default 512 rows -> 512x512 f32 block = 1 MiB
    # (4 MiB with in+out double-buffering), comfortable on v5e/v6e/v7x VMEM.
    if block_rows is None:
        block_rows = 512
    br = max(_SUB, min(block_rows, ((rows + _SUB - 1) // _SUB) * _SUB))
    br = (br // _SUB) * _SUB
    rows_padded = ((rows + br - 1) // br) * br
    n_padded = rows_padded * cols

    flat = x.reshape(-1)
    if n_padded != n:
        flat = jnp.concatenate([flat, jnp.zeros((n_padded - n,), dtype=x.dtype)])
    x2 = flat.reshape(rows_padded, cols)

    seed_arr = jnp.asarray([seed], dtype=jnp.int32)
    kernel = functools.partial(
        _clip_normal_kernel,
        block_rows=br, cols=cols,
        sqrt_sigma=float(sigma) ** 0.5,
        min_val=float(min_val), max_val=float(max_val),
    )

    itemsize = jnp.dtype(x.dtype).itemsize
    cost = pl.CostEstimate(
        flops=45 * n_padded,               # hash + erfinv polynomial + add/clip
        transcendentals=2 * n_padded,      # log + sqrt per element
        bytes_accessed=2 * n_padded * itemsize,
    )

    out2 = pl.pallas_call(
        kernel,
        out_shape=jax.ShapeDtypeStruct((rows_padded, cols), x.dtype),
        grid_spec=pltpu.PrefetchScalarGridSpec(
            num_scalar_prefetch=1,                       # seed lives in SMEM
            grid=(rows_padded // br,),
            in_specs=[pl.BlockSpec((br, cols), lambda i, seed: (i, 0))],
            out_specs=pl.BlockSpec((br, cols), lambda i, seed: (i, 0)),
        ),
        compiler_params=pltpu.CompilerParams(
            dimension_semantics=("parallel",),           # both TCs on v7x
            vmem_limit_bytes=32 * 1024 * 1024,
        ),
        cost_estimate=cost,
    )(seed_arr, x2)

    # Drop the padded tail before restoring the original shape.
    return out2.reshape(-1)[:n].reshape(orig_shape)


if __name__ == "__main__":
    key = jax.random.PRNGKey(0)
    # Batch of mean vectors (batch=2, seq=8, hidden=32); last dim is the
    # MultivariateNormal event dimension.
    x = jax.random.normal(key, (2, 8, 32), dtype=jnp.float32)

    sigma, min_val, max_val = 0.5, -1.0, 1.0

    out = clip_normal_proposal(x, seed=0, sigma=sigma,
                               min_val=min_val, max_val=max_val)
    out = jax.block_until_ready(out)

    assert out.shape == x.shape, (out.shape, x.shape)
    assert out.dtype == x.dtype
    assert bool(jnp.all(out >= min_val)) and bool(jnp.all(out <= max_val))
    # Noise was actually added (output differs from plainly clipped input).
    assert bool(jnp.any(out != jnp.clip(x, min_val, max_val)))

    # Random stream is keyed on the global flat index + seed, so the result is
    # invariant to the lane-dense slab / tile choice.
    out_a = clip_normal_proposal(x, seed=7, sigma=sigma, min_val=min_val,
                                 max_val=max_val, block_rows=8, cols=128)
    out_b = clip_normal_proposal(x, seed=7, sigma=sigma, min_val=min_val,
                                 max_val=max_val, block_rows=16, cols=256)
    assert bool(jnp.array_equal(out_a, out_b))

    # Unclipped call on a slightly larger batch: noise should be ~N(0, sigma),
    # and must also be invariant to the row-tiling of the grid.
    x_big = jax.random.normal(jax.random.PRNGKey(1), (16, 8, 128), jnp.float32)
    out_big = clip_normal_proposal(x_big, seed=3, sigma=sigma)
    out_big2 = clip_normal_proposal(x_big, seed=3, sigma=sigma, block_rows=8)
    assert bool(jnp.array_equal(out_big, out_big2))
    noise = (out_big - x_big).reshape(-1)
    assert abs(float(jnp.mean(noise))) < 0.05
    assert abs(float(jnp.std(noise)) - sigma ** 0.5) < 0.05

    print("KERNEL_OK")
</pallas_src>

<mosaic_0001>
module attributes {stable_mosaic.version = 11 : i64} {
  func.func @_clip_normal_kernel(%arg0: i32, %arg1: memref<1xi32, #tpu.memory_space<smem>>, %arg2: memref<8x128xf32, #tpu.memory_space<vmem>>, %arg3: memref<8x128xf32, #tpu.memory_space<vmem>>) attributes {dimension_semantics = [#tpu.dimension_semantics<parallel>], iteration_bounds = array<i64: 1>, scalar_prefetch = 1 : i64, scratch_operands = 0 : i64, tpu.core_type = #tpu.core_type<tc>, window_params = [{transform_indices = @transform_0, window_bounds = array<i64: 8, 128>}, {transform_indices = @transform_1, window_bounds = array<i64: 8, 128>}]} {
    %0 = tpu.iota {dimensions = array<i32: 0>} : vector<8x128xi32>
    %1 = tpu.iota {dimensions = array<i32: 1>} : vector<8x128xi32>
    %c8_i32 = arith.constant 8 : i32
    %2 = arith.muli %arg0, %c8_i32 : i32
    %3 = vector.broadcast %2 : i32 to vector<8x128xi32>
    %4 = arith.addi %3, %0 : vector<8x128xi32>
    %c128_i32 = arith.constant 128 : i32
    %5 = vector.broadcast %c128_i32 : i32 to vector<8x128xi32>
    %6 = arith.muli %4, %5 : vector<8x128xi32>
    %7 = arith.addi %6, %1 : vector<8x128xi32>
    %c-1640531527_i32 = arith.constant -1640531527 : i32
    %8 = vector.broadcast %c-1640531527_i32 : i32 to vector<8x128xi32>
    %9 = arith.muli %7, %8 : vector<8x128xi32>
    %c0 = arith.constant 0 : index
    %10 = memref.load %arg1[%c0] : memref<1xi32, #tpu.memory_space<smem>>
    %c-2048144789_i32 = arith.constant -2048144789 : i32
    %11 = arith.addi %10, %c-2048144789_i32 : i32
    %12 = vector.broadcast %11 : i32 to vector<8x128xi32>
    %13 = arith.xori %9, %12 : vector<8x128xi32>
    %c16_i32 = arith.constant 16 : i32
    %14 = vector.broadcast %c16_i32 : i32 to vector<8x128xi32>
    %15 = arith.shrui %13, %14 : vector<8x128xi32>
    %16 = arith.xori %13, %15 : vector<8x128xi32>
    %c2146121005_i32 = arith.constant 2146121005 : i32
    %17 = vector.broadcast %c2146121005_i32 : i32 to vector<8x128xi32>
    %18 = arith.muli %16, %17 : vector<8x128xi32>
    %c15_i32 = arith.constant 15 : i32
    %19 = vector.broadcast %c15_i32 : i32 to vector<8x128xi32>
    %20 = arith.shrui %18, %19 : vector<8x128xi32>
    %21 = arith.xori %18, %20 : vector<8x128xi32>
    %c-2073254261_i32 = arith.constant -2073254261 : i32
    %22 = vector.broadcast %c-2073254261_i32 : i32 to vector<8x128xi32>
    %23 = arith.muli %21, %22 : vector<8x128xi32>
    %c16_i32_0 = arith.constant 16 : i32
    %24 = vector.broadcast %c16_i32_0 : i32 to vector<8x128xi32>
    %25 = arith.shrui %23, %24 : vector<8x128xi32>
    %26 = arith.xori %23, %25 : vector<8x128xi32>
    %c8_i32_1 = arith.constant 8 : i32
    %27 = vector.broadcast %c8_i32_1 : i32 to vector<8x128xi32>
    %28 = arith.shrui %26, %27 : vector<8x128xi32>
    %29 = arith.sitofp %28 : vector<8x128xi32> to vector<8x128xf32>
    %cst = arith.constant 5.000000e-01 : f32
    %30 = vector.broadcast %cst : f32 to vector<8x128xf32>
    %31 = arith.addf %29, %30 : vector<8x128xf32>
    %cst_2 = arith.constant 5.96046448E-8 : f32
    %32 = vector.broadcast %cst_2 : f32 to vector<8x128xf32>
    %33 = arith.mulf %31, %32 : vector<8x128xf32>
    %cst_3 = arith.constant 2.000000e+00 : f32
    %34 = vector.broadcast %cst_3 : f32 to vector<8x128xf32>
    %35 = arith.mulf %34, %33 : vector<8x128xf32>
    %cst_4 = arith.constant 1.000000e+00 : f32
    %36 = vector.broadcast %cst_4 : f32 to vector<8x128xf32>
    %37 = arith.subf %35, %36 : vector<8x128xf32>
    %cst_5 = arith.constant 1.000000e+00 : f32
    %38 = vector.broadcast %cst_5 : f32 to vector<8x128xf32>
    %39 = arith.subf %38, %37 : vector<8x128xf32>
    %cst_6 = arith.constant 1.000000e+00 : f32
    %40 = vector.broadcast %cst_6 : f32 to vector<8x128xf32>
    %41 = arith.addf %40, %37 : vector<8x128xf32>
    %42 = arith.mulf %39, %41 : vector<8x128xf32>
    %43 = math.log %42 : vector<8x128xf32>
    %cst_7 = arith.constant 0.000000e+00 : f32
    %44 = vector.broadcast %cst_7 : f32 to vector<8x128xf32>
    %45 = arith.subf %44, %43 : vector<8x128xf32>
    %cst_8 = arith.constant 2.500000e+00 : f32
    %46 = vector.broadcast %cst_8 : f32 to vector<8x128xf32>
    %47 = arith.subf %45, %46 : vector<8x128xf32>
    %cst_9 = arith.constant 2.81022636E-8 : f32
    %48 = vector.broadcast %cst_9 : f32 to vector<8x128xf32>
    %49 = arith.mulf %48, %47 : vector<8x128xf32>
    %cst_10 = arith.constant 3.43273939E-7 : f32
    %50 = vector.broadcast %cst_10 : f32 to vector<8x128xf32>
    %51 = arith.addf %50, %49 : vector<8x128xf32>
    %52 = arith.mulf %51, %47 : vector<8x128xf32>
    %cst_11 = arith.constant -3.5233877E-6 : f32
    %53 = vector.broadcast %cst_11 : f32 to vector<8x128xf32>
    %54 = arith.addf %53, %52 : vector<8x128xf32>
    %55 = arith.mulf %54, %47 : vector<8x128xf32>
    %cst_12 = arith.constant -4.39150654E-6 : f32
    %56 = vector.broadcast %cst_12 : f32 to vector<8x128xf32>
    %57 = arith.addf %56, %55 : vector<8x128xf32>
    %58 = arith.mulf %57, %47 : vector<8x128xf32>
    %cst_13 = arith.constant 2.1858087E-4 : f32
    %59 = vector.broadcast %cst_13 : f32 to vector<8x128xf32>
    %60 = arith.addf %59, %58 : vector<8x128xf32>
    %61 = arith.mulf %60, %47 : vector<8x128xf32>
    %cst_14 = arith.constant -0.00125372503 : f32
    %62 = vector.broadcast %cst_14 : f32 to vector<8x128xf32>
    %63 = arith.addf %62, %61 : vector<8x128xf32>
    %64 = arith.mulf %63, %47 : vector<8x128xf32>
    %cst_15 = arith.constant -0.00417768164 : f32
    %65 = vector.broadcast %cst_15 : f32 to vector<8x128xf32>
    %66 = arith.addf %65, %64 : vector<8x128xf32>
    %67 = arith.mulf %66, %47 : vector<8x128xf32>
    %cst_16 = arith.constant 0.246640727 : f32
    %68 = vector.broadcast %cst_16 : f32 to vector<8x128xf32>
    %69 = arith.addf %68, %67 : vector<8x128xf32>
    %70 = arith.mulf %69, %47 : vector<8x128xf32>
    %cst_17 = arith.constant 1.50140941 : f32
    %71 = vector.broadcast %cst_17 : f32 to vector<8x128xf32>
    %72 = arith.addf %71, %70 : vector<8x128xf32>
    %73 = math.sqrt %45 : vector<8x128xf32>
    %cst_18 = arith.constant 3.000000e+00 : f32
    %74 = vector.broadcast %cst_18 : f32 to vector<8x128xf32>
    %75 = arith.subf %73, %74 : vector<8x128xf32>
    %cst_19 = arith.constant -2.00214257E-4 : f32
    %76 = vector.broadcast %cst_19 : f32 to vector<8x128xf32>
    %77 = arith.mulf %76, %75 : vector<8x128xf32>
    %cst_20 = arith.constant 1.00950558E-4 : f32
    %78 = vector.broadcast %cst_20 : f32 to vector<8x128xf32>
    %79 = arith.addf %78, %77 : vector<8x128xf32>
    %80 = arith.mulf %79, %75 : vector<8x128xf32>
    %cst_21 = arith.constant 0.00134934322 : f32
    %81 = vector.broadcast %cst_21 : f32 to vector<8x128xf32>
    %82 = arith.addf %81, %80 : vector<8x128xf32>
    %83 = arith.mulf %82, %75 : vector<8x128xf32>
    %cst_22 = arith.constant -0.00367342844 : f32
    %84 = vector.broadcast %cst_22 : f32 to vector<8x128xf32>
    %85 = arith.addf %84, %83 : vector<8x128xf32>
    %86 = arith.mulf %85, %75 : vector<8x128xf32>
    %cst_23 = arith.constant 0.00573950773 : f32
    %87 = vector.broadcast %cst_23 : f32 to vector<8x128xf32>
    %88 = arith.addf %87, %86 : vector<8x128xf32>
    %89 = arith.mulf %88, %75 : vector<8x128xf32>
    %cst_24 = arith.constant -0.0076224613 : f32
    %90 = vector.broadcast %cst_24 : f32 to vector<8x128xf32>
    %91 = arith.addf %90, %89 : vector<8x128xf32>
    %92 = arith.mulf %91, %75 : vector<8x128xf32>
    %cst_25 = arith.constant 0.00943887047 : f32
    %93 = vector.broadcast %cst_25 : f32 to vector<8x128xf32>
    %94 = arith.addf %93, %92 : vector<8x128xf32>
    %95 = arith.mulf %94, %75 : vector<8x128xf32>
    %cst_26 = arith.constant 1.00167406 : f32
    %96 = vector.broadcast %cst_26 : f32 to vector<8x128xf32>
    %97 = arith.addf %96, %95 : vector<8x128xf32>
    %98 = arith.mulf %97, %75 : vector<8x128xf32>
    %cst_27 = arith.constant 2.83297682 : f32
    %99 = vector.broadcast %cst_27 : f32 to vector<8x128xf32>
    %100 = arith.addf %99, %98 : vector<8x128xf32>
    %cst_28 = arith.constant 5.000000e+00 : f32
    %101 = vector.broadcast %cst_28 : f32 to vector<8x128xf32>
    %102 = arith.cmpf olt, %45, %101 : vector<8x128xf32>
    %103 = arith.select %102, %72, %100 : vector<8x128xi1>, vector<8x128xf32>
    %104 = arith.mulf %103, %37 : vector<8x128xf32>
    %cst_29 = arith.constant 1.41421354 : f32
    %105 = vector.broadcast %cst_29 : f32 to vector<8x128xf32>
    %106 = arith.mulf %104, %105 : vector<8x128xf32>
    %c0_30 = arith.constant 0 : index
    %c0_31 = arith.constant 0 : index
    %107 = vector.load %arg2[%c0_30, %c0_31] : memref<8x128xf32, #tpu.memory_space<vmem>>, vector<8x128xf32>
    %cst_32 = arith.constant 0.707106769 : f32
    %108 = vector.broadcast %cst_32 : f32 to vector<8x128xf32>
    %109 = arith.mulf %108, %106 : vector<8x128xf32>
    %110 = arith.addf %107, %109 : vector<8x128xf32>
    %cst_33 = arith.constant -1.000000e+00 : f32
    %111 = vector.broadcast %cst_33 : f32 to vector<8x128xf32>
    %112 = arith.maximumf %110, %111 : vector<8x128xf32>
    %cst_34 = arith.constant 1.000000e+00 : f32
    %113 = vector.broadcast %cst_34 : f32 to vector<8x128xf32>
    %114 = arith.minimumf %112, %113 : vector<8x128xf32>
    %c0_35 = arith.constant 0 : index
    %c0_36 = arith.constant 0 : index
    %115 = vector.load %arg3[%c0_35, %c0_36] : memref<8x128xf32, #tpu.memory_space<vmem>>, vector<8x128xf32>
    tpu.vector_store %arg3[%c0_35, %c0_36], %114 {strides = array<i32>} : memref<8x128xf32, #tpu.memory_space<vmem>>, vector<8x128xf32>,
    return
  }
  func.func @transform_0(%arg0: i32, %arg1: memref<1xi32, #tpu.memory_space<smem>>) -> (i32, i32) {
    %c0_i32 = arith.constant 0 : i32
    %c0_i32_0 = arith.constant 0 : i32
    return %arg0, %c0_i32 : i32, i32
  }
  func.func @transform_1(%arg0: i32, %arg1: memref<1xi32, #tpu.memory_space<smem>>) -> (i32, i32) {
    %c0_i32 = arith.constant 0 : i32
    %c0_i32_0 = arith.constant 0 : i32
    return %arg0, %c0_i32 : i32, i32
  }
}

</mosaic_0001>

<bundles_post_ra>
// kernel: tpu_custom_call.1
= control target key start
LH: loop header
LB: loop body
LE: loop exit
PB: predicated region body
PF: predicated region fallthrough
CT: control target
= control target key end

     0   :  { %8 = vsyncpa [#allocation5], 0  ;;  %s225_s0 = inlined_call_operand.<no memory space> [shape: s32[1], index: 0, kind: input, shape index: {}]   ;;  %s226_s1 = inlined_call_operand.hbm [shape: f32[8,128], index: 1, kind: input, shape index: {}]   ;;  %s227_s2 = inlined_call_operand.hbm [shape: f32[8,128], index: 2, kind: output, shape index: {}]  }
   0x1   :  { %9 = vsyncpa [#allocation6], 0  ;;  %s181_s9 = smov [#allocation4]   ;;  %s133_s13 = scalar_lea.hbm %s226_s1, 128 }
   0x2   :  { %s16_s10 = sshll.u32 %s181_s9, 4  ;;  %p134_p0 = scmp.ne.s32.totalorder %s226_s1, %s133_s13  ;;  %s17_s10 = int_to_ptr.vmem [resolvable:$true] %s16_s10 }
   0x3   :  { %p137_p1 = scmp.lt.u32.totalorder %s133_s13, %s226_s1 }
   0x5   :  { %p139_p2 = pnand %p137_p1, %p134_p0 }
   0x7   :  { %142 = shalt.err (!%p139_p2)
}
   0x8   :  { %s143_s18 = scalar_lea.vmem %s17_s10, 128  ;;  %p148_p4 = scmp.lt.s32.totalorder %s17_s10, %s17_s10 }
   0x9   :  { %p144_p3 = scmp.ne.s32.totalorder %s17_s10, %s143_s18  ;;  %p149_p5 = scmp.lt.s32.totalorder %s143_s18, %s143_s18 }
   0xb   :  { %p150_p6 = por %p149_p5, %p148_p4 }
   0xd   :  { %p151_p7 = pnand %p150_p6, %p144_p3 }
   0xf   :  { %154 = shalt.err (!%p151_p7)
}
  0x10   :  { %19 = dma.hbm_to_vmem [thread:$0]  %s226_s1, 128, %s17_s10, [#allocation5]  }
  0x11   :  { %177 = dma.done.wait [#allocation5], 128  }
  0x12   :  { %178 = vsyncadd [#allocation5], 4294967168  ;;  %v23_v0 = vlaneseq  ;;  %s34_s23 = sadd.s32 2246822507, %s225_s0  ;;  %s182_s0 = smov [#allocation7]  }
  0x13   :  { %v35_v5 = vstv %s34_s23  ;;  %s114_s1 = sshll.u32 %s182_s0, 4  ;;  %s115_s1 = int_to_ptr.vmem [resolvable:$true] %s114_s1 }
  0x14   :  { %v24_v1 = vshrl.u32 %v23_v0, 7  ;;  %v26_v2 = vand.u32 127, %v23_v0  ;;  %s155_s24 = scalar_lea.vmem %s115_s1, 128  ;;  %p160_p9 = scmp.lt.s32.totalorder %s115_s1, %s115_s1 }
  0x15   :  { %p156_p8 = scmp.ne.s32.totalorder %s115_s1, %s155_s24  ;;  %p161_p10 = scmp.lt.s32.totalorder %s155_s24, %s155_s24 }
  0x16   :  { %v30_v3 = vmul.u32 128, %v24_v1 }
  0x17   :  { %p162_p11 = por %p161_p10, %p160_p9 }
  0x18   :  { %v31_v4 = vadd.s32 %v30_v3, %v26_v2 }
  0x19   :  { %p163_p12 = pnand %p162_p11, %p156_p8 }
  0x1a   :  { %v32_v6 = vmul.u32 2654435769, %v31_v4 }
  0x1c   :  { %v36_v7 = vxor.u32 %v35_v5, %v32_v6  ;;  %v102_v6 = vld [vmem:[#allocation4] sm:$0xff] }
  0x1e   :  { %v37_v8 = vshrl.u32 %v36_v7, 16 }
  0x20   :  { %v38_v9 = vxor.u32 %v37_v8, %v36_v7 }
  0x22   :  { %v39_v10 = vmul.u32 2146121005, %v38_v9 }
  0x24   :  { %v40_v11 = vshrl.u32 %v39_v10, 15 }
  0x26   :  { %v41_v12 = vxor.u32 %v40_v11, %v39_v10 }
  0x28   :  { %v42_v13 = vmul.u32 2221713035, %v41_v12 }
  0x2a   :  { %v43_v14 = vshrl.u32 %v42_v13, 16 }
  0x2c   :  { %v44_v15 = vxor.u32 %v43_v14, %v42_v13 }
  0x2e   :  { %v45_v16 = vshrl.u32 %v44_v15, 8 }
  0x30   :  { %v46_v17 = vcvt.s32.f32 %v45_v16 }
  0x32   :  { %v47_v18 = vadd.f32 0.5, %v46_v17 }
  0x34   :  { %v48_v19 = vmul.f32 5.9604645e-08, %v47_v18 }
  0x36   :  { %v49_v20 = vmul.f32 2.0, %v48_v19 }
  0x38   :  { %v123_v21 = vadd.f32 -1.0, %v49_v20 }
  0x3a   :  { %v51_v22 = vsub.f32 1.0, %v123_v21  ;;  %v52_v23 = vadd.f32 1.0, %v123_v21 }
  0x3c   :  { %v53_v24 = vmul.f32 %v52_v23, %v51_v22 }
  0x3e   :  { %129 = vlog2.f32 %v53_v24 }
  0x48   :  { %v130_v25 = vpop.eup %129 }
  0x49   :  { %v55_v26 = vmul.f32 0.6931472, %v130_v25 }
  0x4b   :  { %v56_v27 = vsub.f32 0.0, %v55_v26 }
  0x4d   :  { %v124_v28 = vadd.f32 -2.5, %v56_v27  ;;  %131 = vrsqrt.f32 %v56_v27  ;;  %vm76_vm0 = vcmp.eq.f32.partialorder %v56_v27, inf  ;;  %v79_v35 = vand.u32 2147483648, %v56_v27 }
  0x4e   :  { %vm78_vm1 = vcmp.eq.f32.partialorder %v56_v27, 0.0  ;;  %vm98_vm2 = vcmp.lt.f32.partialorder %v56_v27, 5.0 }
  0x4f   :  { %v58_v29 = vmul.f32 2.8102264e-08, %v124_v28 }
  0x51   :  { %v59_v30 = vadd.f32 3.4327394e-07, %v58_v29 }
  0x53   :  { %v60_v31 = vmul.f32 %v124_v28, %v59_v30 }
  0x55   :  { %v61_v32 = vadd.f32 -3.5233877e-06, %v60_v31 }
  0x57   :  { %v132_v33 = vpop.eup %131  ;;  %v62_v34 = vmul.f32 %v124_v28, %v61_v32 }
  0x58   :  { %v75_v36 = vmul.f32 %v132_v33, %v56_v27 }
  0x59   :  { %v63_v37 = vadd.f32 -4.3915065e-06, %v62_v34 }
  0x5a   :  { %v77_v38 = vsel %vm76_vm0, %v56_v27, %v75_v36 }
  0x5b   :  { %v64_v39 = vmul.f32 %v124_v28, %v63_v37  ;;  %v80_v40 = vsel %vm78_vm1, %v79_v35, %v77_v38 }
  0x5c   :  { %v125_v41 = vadd.f32 -3.0, %v80_v40 }
  0x5d   :  { %v65_v42 = vadd.f32 0.00021858087, %v64_v39 }
  0x5e   :  { %v82_v43 = vmul.f32 -0.00020021426, %v125_v41 }
  0x5f   :  { %v66_v44 = vmul.f32 %v124_v28, %v65_v42 }
  0x60   :  { %v83_v45 = vadd.f32 0.00010095056, %v82_v43 }
  0x61   :  { %v67_v46 = vadd.f32 -0.001253725, %v66_v44 }
  0x62   :  { %v84_v47 = vmul.f32 %v125_v41, %v83_v45 }
  0x63   :  { %v68_v49 = vmul.f32 %v124_v28, %v67_v46 }
  0x64   :  { %v85_v48 = vadd.f32 0.0013493432, %v84_v47 }
  0x65   :  { %v69_v52 = vadd.f32 -0.0041776816, %v68_v49 }
  0x66   :  { %v86_v50 = vmul.f32 %v125_v41, %v85_v48 }
  0x67   :  { %v70_v55 = vmul.f32 %v124_v28, %v69_v52 }
  0x68   :  { %v87_v51 = vadd.f32 -0.0036734284, %v86_v50 }
  0x69   :  { %v71_v58 = vadd.f32 0.24664073, %v70_v55 }
  0x6a   :  { %v88_v53 = vmul.f32 %v125_v41, %v87_v51 }
  0x6b   :  { %v72_v61 = vmul.f32 %v124_v28, %v71_v58 }
  0x6c   :  { %v89_v54 = vadd.f32 0.0057395077, %v88_v53 }
  0x6d   :  { %v73_v0 = vadd.f32 1.5014094, %v72_v61 }
  0x6e   :  { %v90_v56 = vmul.f32 %v125_v41, %v89_v54 }
  0x70   :  { %v91_v57 = vadd.f32 -0.0076224613, %v90_v56 }
  0x72   :  { %v92_v59 = vmul.f32 %v125_v41, %v91_v57 }
  0x74   :  { %v93_v60 = vadd.f32 0.0094388705, %v92_v59 }
  0x76   :  { %v94_v62 = vmul.f32 %v125_v41, %v93_v60 }
  0x78   :  { %v95_v63 = vadd.f32 1.001674, %v94_v62 }
  0x7a   :  { %v96_v1 = vmul.f32 %v125_v41, %v95_v63 }
  0x7c   :  { %v97_v2 = vadd.f32 2.8329768, %v96_v1 }
  0x7e   :  { %v99_v3 = vsel %vm98_vm2, %v73_v0, %v97_v2 }
  0x7f   :  { %v100_v4 = vmul.f32 %v123_v21, %v99_v3 }
  0x81   :  { %v101_v5 = vmul.f32 1.4142135, %v100_v4 }
  0x83   :  { %v103_v7 = vmul.f32 0.70710677, %v101_v5 }
  0x85   :  { %v104_v8 = vadd.f32 %v103_v7, %v102_v6 }
  0x87   :  { %v126_v9 = vclamps-f32 %v104_v8, 1.0 }
  0x89   :  { %107 = vst [vmem:[#allocation7] sm:$0xff] %v126_v9 }
  0x8a   :  { %166 = shalt.err (!%p163_p12)
}
  0x8b   :  { %s167_s27 = scalar_lea.hbm %s227_s2, 128 }
  0x8c   :  { %p168_p13 = scmp.ne.s32.totalorder %s227_s2, %s167_s27  ;;  %p171_p0 = scmp.lt.u32.totalorder %s167_s27, %s227_s2 }
  0x8e   :  { %p173_p1 = pnand %p171_p0, %p168_p13 }
  0x90   :  { %176 = shalt.err (!%p173_p1)
}
  0x91   :  { %117 = dma.vmem_to_hbm [thread:$0]  %s115_s1, 128, %s227_s2, [#allocation6]  }
  0x92   :  { %179 = dma.done.wait [#allocation6], 128  }
  0x93   :  { %180 = vsyncadd [#allocation6], 4294967168 }
  0x94   :  { %121 = vsyncpa [#allocation5], 1 }
  0x95   :  { %122 = vsyncpa [#allocation6], 1 }

</bundles_post_ra>
